<compile_context>
chip_gen: v6e
topology: v6e:2x2x1
jax: 0.10.0
libtpu: 0.0.40
codegen_flags: <defaults>
</compile_context>

<pallas_src>
import jax
import jax.numpy as jnp
from jax.experimental import pallas as pl
from jax.experimental.pallas import tpu as pltpu

LANE = 128
MAX_NP = 2048  # guard: ungridded bf16 adjacency block must stay well inside scoped VMEM


def _round_up(x, m):
    return ((x + m - 1) // m) * m


def _choose_tb(B):
    """Batch tile: big (<=1024) to amortize per-step overhead, multiple of 8,
    and >= 2 grid steps whenever B > 8 so megacore can split the batch axis."""
    if B <= 8:
        return B
    half = _round_up(B, 8) // 2
    return min(1024, max(8, (half // 8) * 8))


# ----------------------------------------------------------------------------
# Kernel 1: GCN branch (seq-independent) -> g^T [Hp, Np] in bf16
#   inputs already padded/aligned; emb @ W1 pre-folded into xw1.
# ----------------------------------------------------------------------------
def gcn_kernel(adj_ref, xw1_ref, b_ref, w2_ref, gt_ref):
    adj = adj_ref[...]                         # bf16 [Np, Np]
    b1 = b_ref[0:1, :]                         # f32  [1, Hp]
    b2 = b_ref[1:2, :]                         # f32  [1, Hp]
    # layer 1: h = relu(adj @ (x @ W1) + b1); (x @ W1) precomputed offline.
    h = jnp.dot(adj, xw1_ref[...], preferred_element_type=jnp.float32) + b1
    h = jnp.maximum(h, 0.0)
    # layer 2: g = adj @ (h @ W2) + b2
    hw2 = jnp.dot(h.astype(jnp.bfloat16), w2_ref[...],
                  preferred_element_type=jnp.float32)
    g = jnp.dot(adj, hw2.astype(jnp.bfloat16),
                preferred_element_type=jnp.float32) + b2
    # store pre-transposed so the head kernel needs no per-step XLU transpose
    gt_ref[...] = g.T.astype(jnp.bfloat16)     # [Hp, Np]


# ----------------------------------------------------------------------------
# Kernel 2: per-batch head: out = sigmoid(relu(seq @ Wf + bf) @ g^T)
#   batch-gridded; weights and g^T stay resident across grid steps.
# ----------------------------------------------------------------------------
def head_kernel(seq_ref, wf_ref, bf_ref, gt_ref, out_ref):
    # seq arrives in bf16 -> no in-kernel cast of the dominant HBM stream
    s = jnp.dot(seq_ref[...], wf_ref[...],
                preferred_element_type=jnp.float32) + bf_ref[...]
    s = jnp.maximum(s, 0.0)
    logits = jnp.dot(s.astype(jnp.bfloat16), gt_ref[...],
                     preferred_element_type=jnp.float32)
    out_ref[...] = jax.nn.sigmoid(logits).astype(out_ref.dtype)   # bf16, lane-dense


# ----------------------------------------------------------------------------
# Glue
# ----------------------------------------------------------------------------
def prepare_graph(node, adj, prep):
    """One-time (per graph) prep: embedding gather + 128-lane padding."""
    N = adj.shape[0]
    Np = _round_up(N, LANE)
    Hp = prep["Hp"]
    # TODO(synk): row-tile the GCN kernel instead of guarding once Np exceeds ~2048.
    assert Np <= MAX_NP, f"ungridded GCN adjacency block needs Np<= {MAX_NP}, got {Np}"
    xw1 = jnp.take(prep["xw1_table"], node, axis=0)                      # [N, Hp] bf16
    xw1_p = jnp.zeros((Np, Hp), jnp.bfloat16).at[:N, :].set(xw1)
    adj_p = jnp.zeros((Np, Np), jnp.bfloat16).at[:N, :N].set(adj.astype(jnp.bfloat16))
    return {"adj_p": adj_p, "xw1_p": xw1_p, "N": N, "Np": Np}


def gcn_forward(graph, prep):
    """g^T = GCN(Embedder(node), adj)^T, padded to [Hp, Np] bf16. Run once per graph."""
    Np, Hp = graph["Np"], prep["Hp"]
    vmem = pl.BlockSpec(memory_space=pltpu.MemorySpace.VMEM)
    return pl.pallas_call(
        gcn_kernel,
        out_shape=jax.ShapeDtypeStruct((Hp, Np), jnp.bfloat16),
        in_specs=[vmem] * 4,
        out_specs=vmem,
    )(graph["adj_p"], graph["xw1_p"], prep["b_gcn"], prep["w2"])


def head_forward(seq, gT, prep):
    assert seq.dtype == jnp.bfloat16, (
        "seq must be produced/stored in bf16 upstream (do not cast right before the call)")
    B, seq_in = seq.shape
    Hp, Np = gT.shape
    tb = _choose_tb(B)
    Bp = _round_up(B, tb)
    if Bp != B:
        seq = jnp.pad(seq, ((0, Bp - B), (0, 0)))   # only for ragged batches
    out = pl.pallas_call(
        head_kernel,
        out_shape=jax.ShapeDtypeStruct((Bp, Np), jnp.bfloat16),
        grid=(Bp // tb,),
        in_specs=[
            pl.BlockSpec((tb, seq_in), lambda i: (i, 0)),
            pl.BlockSpec((seq_in, Hp), lambda i: (0, 0)),
            pl.BlockSpec((1, Hp), lambda i: (0, 0)),
            pl.BlockSpec((Hp, Np), lambda i: (0, 0)),
        ],
        out_specs=pl.BlockSpec((tb, Np), lambda i: (i, 0)),
        compiler_params=pltpu.CompilerParams(
            dimension_semantics=("parallel",)),
    )(seq, prep["wf"], prep["bf"], gT)
    return out[:B]


def net_forward(seq, node, adj, prep, gT=None):
    """Full Net forward. `gT` may be precomputed once and reused across seq batches."""
    if gT is None:
        gT = gcn_forward(prepare_graph(node, adj, prep), prep)
    out = head_forward(seq, gT, prep)                       # [B, Np] bf16
    return out[:, :adj.shape[0]].astype(jnp.float32)        # drop lane padding -> [B, N] f32


# ----------------------------------------------------------------------------
# Parameters
# ----------------------------------------------------------------------------
def init_params(key, *, n_class, seq_in=1024, seqfeat=32, nfeat=32, nhid=32):
    assert seqfeat == nhid, "final matmul requires seqfeat == GCN output dim"
    ks = jax.random.split(key, 4)
    s = 0.02
    return {
        "wf": jax.random.normal(ks[0], (seq_in, seqfeat), jnp.float32) * s,   # FC(1024, F)
        "bf": jnp.zeros((seqfeat,), jnp.float32),
        "emb": jax.random.normal(ks[1], (n_class, nfeat), jnp.float32) * s,   # Embedder
        "w1": jax.random.normal(ks[2], (nfeat, nhid), jnp.float32) * s,       # GCN layer 1
        "b1": jnp.zeros((nhid,), jnp.float32),
        "w2": jax.random.normal(ks[3], (nhid, nhid), jnp.float32) * s,        # GCN layer 2
        "b2": jnp.zeros((nhid,), jnp.float32),
    }


def prepare_params(params):
    """One-time offline prep: bf16 weights, 128-lane padding, emb@W1 folding, bias packing."""
    seq_in, H = params["wf"].shape
    Hp = _round_up(H, LANE)
    pad_c = lambda a: jnp.pad(a, ((0, 0), (0, Hp - a.shape[1])))
    pad_v = lambda v: jnp.pad(v, (0, Hp - v.shape[0]))

    wf_p = pad_c(params["wf"]).astype(jnp.bfloat16)                            # [1024, Hp]
    bf_p = pad_v(params["bf"]).reshape(1, Hp).astype(jnp.float32)              # [1, Hp]
    xw1_table = pad_c(params["emb"] @ params["w1"]).astype(jnp.bfloat16)       # [n_class, Hp]
    w2_p = jnp.pad(params["w2"], ((0, Hp - H), (0, Hp - H))).astype(jnp.bfloat16)
    b_gcn = jnp.stack([pad_v(params["b1"]), pad_v(params["b2"])]).astype(jnp.float32)  # [2, Hp]

    return {"wf": wf_p, "bf": bf_p, "xw1_table": xw1_table,
            "w2": w2_p, "b_gcn": b_gcn, "Hp": Hp}


if __name__ == "__main__":
    key = jax.random.PRNGKey(0)
    k_seq, k_node, k_adj, k_param = jax.random.split(key, 4)

    B = 2          # batch
    N = 16         # graph nodes
    n_class = 10   # embedding vocabulary
    seqfeat = nfeat = nhid = 32

    # seq is produced & stored in bf16 upstream (halves the dominant HBM stream).
    seq = jax.random.normal(k_seq, (B, 1024), jnp.float32).astype(jnp.bfloat16)
    node = jax.random.randint(k_node, (N,), 0, n_class, jnp.int32)
    adj_raw = jax.random.uniform(k_adj, (N, N), jnp.float32)
    adj = (adj_raw + adj_raw.T) * 0.5            # symmetric "normalized" adjacency
    adj = adj / jnp.sum(adj, axis=-1, keepdims=True)

    raw = init_params(k_param, n_class=n_class,
                      seqfeat=seqfeat, nfeat=nfeat, nhid=nhid)
    prep = prepare_params(raw)

    # GCN branch is seq-independent: gather/pad + kernel run once, reuse g^T per batch.
    graph = prepare_graph(node, adj, prep)
    gT = gcn_forward(graph, prep)
    out = net_forward(seq, node, adj, prep, gT=gT)
    out = jax.block_until_ready(out)

    assert out.shape == (B, N)
    assert bool(jnp.all(jnp.isfinite(out)))
    assert bool(jnp.all((out > 0.0) & (out < 1.0)))
    print("KERNEL_OK")
</pallas_src>

<mosaic_0001>
module attributes {stable_mosaic.version = 11 : i64} {
  func.func @gcn_kernel(%arg0: memref<128x128xbf16, #tpu.memory_space<vmem>>, %arg1: memref<128x128xbf16, #tpu.memory_space<vmem>>, %arg2: memref<2x128xf32, #tpu.memory_space<vmem>>, %arg3: memref<128x128xbf16, #tpu.memory_space<vmem>>, %arg4: memref<128x128xbf16, #tpu.memory_space<vmem>>) attributes {dimension_semantics = [], scalar_prefetch = 0 : i64, scratch_operands = 0 : i64, tpu.core_type = #tpu.core_type<tc>} {
    %c0 = arith.constant 0 : index
    %c0_0 = arith.constant 0 : index
    %0 = vector.load %arg0[%c0, %c0_0] : memref<128x128xbf16, #tpu.memory_space<vmem>>, vector<128x128xbf16>
    %c0_1 = arith.constant 0 : index
    %c0_2 = arith.constant 0 : index
    %1 = vector.load %arg2[%c0_1, %c0_2] : memref<2x128xf32, #tpu.memory_space<vmem>>, vector<1x128xf32>
    %c1 = arith.constant 1 : index
    %c0_3 = arith.constant 0 : index
    %2 = vector.load %arg2[%c1, %c0_3] : memref<2x128xf32, #tpu.memory_space<vmem>>, vector<1x128xf32>
    %c0_4 = arith.constant 0 : index
    %c0_5 = arith.constant 0 : index
    %3 = vector.load %arg1[%c0_4, %c0_5] : memref<128x128xbf16, #tpu.memory_space<vmem>>, vector<128x128xbf16>
    %cst = arith.constant dense<0.000000e+00> : vector<128x128xf32>
    %4 = tpu.matmul %0, %3, %cst {dimension_numbers = #tpu.dot_dimension_numbers<[1], [0], [0], [1], [0, 0, 1, 1], [], []>} : vector<128x128xbf16>, vector<128x128xbf16>, vector<128x128xf32> -> vector<128x128xf32>
    %5 = vector.broadcast %1 : vector<1x128xf32> to vector<128x128xf32>
    %6 = arith.addf %4, %5 : vector<128x128xf32>
    %cst_6 = arith.constant 0.000000e+00 : f32
    %7 = vector.broadcast %cst_6 : f32 to vector<128x128xf32>
    %8 = arith.maximumf %6, %7 : vector<128x128xf32>
    %9 = arith.truncf %8 : vector<128x128xf32> to vector<128x128xbf16>
    %c0_7 = arith.constant 0 : index
    %c0_8 = arith.constant 0 : index
    %10 = vector.load %arg3[%c0_7, %c0_8] : memref<128x128xbf16, #tpu.memory_space<vmem>>, vector<128x128xbf16>
    %cst_9 = arith.constant dense<0.000000e+00> : vector<128x128xf32>
    %11 = tpu.matmul %9, %10, %cst_9 {dimension_numbers = #tpu.dot_dimension_numbers<[1], [0], [0], [1], [0, 0, 1, 1], [], []>} : vector<128x128xbf16>, vector<128x128xbf16>, vector<128x128xf32> -> vector<128x128xf32>
    %12 = arith.truncf %11 : vector<128x128xf32> to vector<128x128xbf16>
    %cst_10 = arith.constant dense<0.000000e+00> : vector<128x128xf32>
    %13 = tpu.matmul %0, %12, %cst_10 {dimension_numbers = #tpu.dot_dimension_numbers<[1], [0], [0], [1], [0, 0, 1, 1], [], []>} : vector<128x128xbf16>, vector<128x128xbf16>, vector<128x128xf32> -> vector<128x128xf32>
    %14 = vector.broadcast %2 : vector<1x128xf32> to vector<128x128xf32>
    %15 = arith.addf %13, %14 : vector<128x128xf32>
    %16 = tpu.transpose %15, [1, 0] : vector<128x128xf32> -> vector<128x128xf32>
    %17 = arith.truncf %16 : vector<128x128xf32> to vector<128x128xbf16>
    %c0_11 = arith.constant 0 : index
    %c0_12 = arith.constant 0 : index
    %18 = vector.load %arg4[%c0_11, %c0_12] : memref<128x128xbf16, #tpu.memory_space<vmem>>, vector<128x128xbf16>
    tpu.vector_store %arg4[%c0_11, %c0_12], %17 {strides = array<i32>} : memref<128x128xbf16, #tpu.memory_space<vmem>>, vector<128x128xbf16>,
    return
  }
}

</mosaic_0001>

<bundles_post_ra>
// kernel: tpu_custom_call.1
= control target key start
LH: loop header
LB: loop body
LE: loop exit
PB: predicated region body
PF: predicated region fallthrough
CT: control target
= control target key end

     0   :  { %9 = vsyncpa [#allocation3], 0  ;;  %s1185_s0 = inlined_call_operand.hbm [shape: bf16[128,128], index: 0, kind: input, shape index: {}]   ;;  %s1186_s1 = inlined_call_operand.hbm [shape: bf16[128,128], index: 1, kind: input, shape index: {}]   ;;  %s1187_s2 = inlined_call_operand.vmem [shape: f32[2,128], index: 2, kind: input, shape index: {}]   ;;  %s1188_s3 = inlined_call_operand.hbm [shape: bf16[128,128], index: 3, kind: input, shape index: {}]   ;;  %s1189_s4 = inlined_call_operand.hbm [shape: bf16[128,128], index: 4, kind: output, shape index: {}]  }
   0x1   :  { %10 = vsyncpa [#allocation6], 0 }
   0x2   :  { %11 = vsyncpa [#allocation4], 0  ;;  %s1096_s15 = smov [#allocation5]   ;;  %s1097_s17 = smov [#allocation2]  }
   0x3   :  { %s29_s16 = sshll.u32 %s1096_s15, 4  ;;  %s17_s18 = sshll.u32 %s1097_s17, 4  ;;  %s30_s16 = int_to_ptr.vmem [resolvable:$true] %s29_s16  ;;  %s18_s18 = int_to_ptr.vmem [resolvable:$true] %s17_s18 }
   0x4   :  { %s1018_s19 = scalar_lea.vmem %s30_s16, 1024  ;;  %p1023_p1 = scmp.lt.s32.totalorder %s30_s16, %s30_s16 }
   0x5   :  { %p1019_p0 = scmp.ne.s32.totalorder %s30_s16, %s1018_s19  ;;  %p1024_p2 = scmp.lt.s32.totalorder %s1018_s19, %s1018_s19 }
   0x7   :  { %p1025_p3 = por %p1024_p2, %p1023_p1 }
   0x9   :  { %p1026_p4 = pnand %p1025_p3, %p1019_p0 }
   0xb   :  { %1029 = shalt.err (!%p1026_p4)
}
   0xc   :  { %s1098_s20 = smov 64   ;;  %s1099_s21 = smov 4  }
   0xd   :  { %35 = dma.hbm_to_vmem [thread:$0]  %s1186_s1, 1024, %s30_s16, [#allocation6], %s1098_s20, %s1098_s20, %s1099_s21  }
   0xe   :  { %s1038_s24 = scalar_lea.vmem %s18_s18, 1024  ;;  %p1043_p6 = scmp.lt.s32.totalorder %s18_s18, %s18_s18 }
   0xf   :  { %p1039_p5 = scmp.ne.s32.totalorder %s18_s18, %s1038_s24  ;;  %p1044_p7 = scmp.lt.s32.totalorder %s1038_s24, %s1038_s24 }
  0x11   :  { %p1045_p8 = por %p1044_p7, %p1043_p6 }
  0x13   :  { %p1046_p9 = pnand %p1045_p8, %p1039_p5 }
  0x15   :  { %1049 = shalt.err (!%p1046_p9)
}
  0x16   :  { %23 = dma.hbm_to_vmem [thread:$0]  %s1185_s0, 1024, %s18_s18, [#allocation3], %s1098_s20, %s1098_s20, %s1099_s21  }
  0x17   :  { %s1100_s27 = smov [#allocation7]  }
  0x18   :  { %s43_s28 = sshll.u32 %s1100_s27, 4  ;;  %s44_s28 = int_to_ptr.vmem [resolvable:$true] %s43_s28 }
  0x19   :  { %s1058_s29 = scalar_lea.vmem %s44_s28, 1024  ;;  %p1063_p11 = scmp.lt.s32.totalorder %s44_s28, %s44_s28 }
  0x1a   :  { %p1059_p10 = scmp.ne.s32.totalorder %s44_s28, %s1058_s29  ;;  %p1064_p12 = scmp.lt.s32.totalorder %s1058_s29, %s1058_s29 }
  0x1c   :  { %p1065_p13 = por %p1064_p12, %p1063_p11 }
  0x1e   :  { %p1066_p0 = pnand %p1065_p13, %p1059_p10 }
  0x20   :  { %1069 = shalt.err (!%p1066_p0)
}
  0x21   :  { %49 = dma.hbm_to_vmem [thread:$0]  %s1188_s3, 1024, %s44_s28, [#allocation6], %s1098_s20, %s1098_s20, %s1099_s21  }
  0x22   :  { %1090 = dma.done.wait [#allocation3], 1024  }
  0x23   :  { %1091 = vsyncadd [#allocation3], 4294966272 }
  0x24   :  { %1092 = dma.done.wait [#allocation6], 2048  }
  0x25   :  { %1093 = vsyncadd [#allocation6], 4294965248  ;;  %v986_v0 = vld [vmem:[#allocation5 + $0x38] sm:$0xff]   ;;  %v987_v1 = vld [vmem:[#allocation5 + $0x30] sm:$0xff]  }
  0x26   :  { %868 = vmatprep.subr.bf16.mxu0 %v986_v0  ;;  %v988_v2 = vld [vmem:[#allocation5 + $0x28] sm:$0xff]   ;;  %v989_v3 = vld [vmem:[#allocation5 + $0x20] sm:$0xff]   ;;  %v990_v5 = vld [vmem:[#allocation5 + $0x18] sm:$0xff]  }
  0x27   :  { %869 = vmatpush3.bf16.msra.mxu0 %v986_v0  ;;  %v994_v4 = vld [vmem:[#allocation2] sm:$0xff]   ;;  %v991_v6 = vld [vmem:[#allocation5 + $0x10] sm:$0xff]   ;;  %v1002_v7 = vld [vmem:[#allocation7 + $0x38] sm:$0xff]  }
  0x28   :  { %870 = vmatprep.subr.bf16.mxu0 %v987_v1  ;;  %884 = vmatprep.mubr.bf16.mxu0 %v994_v4  ;;  %v1003_v8 = vld [vmem:[#allocation7 + $0x30] sm:$0xff]   ;;  %v992_v9 = vld [vmem:[#allocation5 + $0x8] sm:$0xff]   ;;  %v993_v11 = vld [vmem:[#allocation5] sm:$0xff]  }
  0x29   :  { %900 = vmatprep.subr.bf16.mxu1 %v1002_v7  ;;  %v1004_v10 = vld [vmem:[#allocation7 + $0x28] sm:$0xff]   ;;  %v1005_v12 = vld [vmem:[#allocation7 + $0x20] sm:$0xff]   ;;  %v1006_v13 = vld [vmem:[#allocation7 + $0x18] sm:$0xff]  }
  0x2a   :  { %901 = vmatpush3.bf16.msra.mxu1 %v1002_v7  ;;  %v1145_v14 = vld [vmem:[#allocation2 + $0x8] sm:$0xff]   ;;  %v1147_v15 = vld [vmem:[#allocation2 + $0x10] sm:$0xff]   ;;  %v1151_v16 = vld [vmem:[#allocation2 + $0x18] sm:$0xff]  }
  0x2b   :  { %871 = vmatpush3.bf16.msra.mxu0 %v987_v1  ;;  %902 = vmatprep.subr.bf16.mxu1 %v1003_v8  ;;  %v1153_v17 = vld [vmem:[#allocation2 + $0x20] sm:$0xff]   ;;  %v1157_v18 = vld [vmem:[#allocation2 + $0x28] sm:$0xff]   ;;  %v1159_v19 = vld [vmem:[#allocation2 + $0x30] sm:$0xff]  }
  0x2c   :  { %872 = vmatprep.subr.bf16.mxu0 %v988_v2  ;;  %v1163_v20 = vld [vmem:[#allocation2 + $0x38] sm:$0xff]   ;;  %v1007_v21 = vld [vmem:[#allocation7 + $0x10] sm:$0xff]   ;;  %v1008_v22 = vld [vmem:[#allocation7 + $0x8] sm:$0xff]  }
  0x2d   :  { %v1009_v23 = vld [vmem:[#allocation7] sm:$0xff]  }
  0x2e   :  { %903 = vmatpush3.bf16.msra.mxu1 %v1003_v8  ;;  %v715_v26 = vld [vmem:[%s1187_s2] ss:$0 sm:$0xff] }
  0x2f   :  { %873 = vmatpush3.bf16.msra.mxu0 %v988_v2  ;;  %904 = vmatprep.subr.bf16.mxu1 %v1004_v10 }
  0x30   :  { %874 = vmatprep.subr.bf16.mxu0 %v989_v3 }
  0x32   :  { %905 = vmatpush3.bf16.msra.mxu1 %v1004_v10 }
  0x33   :  { %875 = vmatpush3.bf16.msra.mxu0 %v989_v3  ;;  %906 = vmatprep.subr.bf16.mxu1 %v1005_v12 }
  0x34   :  { %876 = vmatprep.subr.bf16.mxu0 %v990_v5 }
  0x36   :  { %907 = vmatpush3.bf16.msra.mxu1 %v1005_v12 }
  0x37   :  { %877 = vmatpush3.bf16.msra.mxu0 %v990_v5  ;;  %908 = vmatprep.subr.bf16.mxu1 %v1006_v13 }
  0x38   :  { %878 = vmatprep.subr.bf16.mxu0 %v991_v6 }
  0x3a   :  { %909 = vmatpush3.bf16.msra.mxu1 %v1006_v13 }
  0x3b   :  { %879 = vmatpush3.bf16.msra.mxu0 %v991_v6  ;;  %910 = vmatprep.subr.bf16.mxu1 %v1007_v21 }
  0x3c   :  { %880 = vmatprep.subr.bf16.mxu0 %v992_v9 }
  0x3e   :  { %911 = vmatpush3.bf16.msra.mxu1 %v1007_v21 }
  0x3f   :  { %881 = vmatpush3.bf16.msra.mxu0 %v992_v9  ;;  %912 = vmatprep.subr.bf16.mxu1 %v1008_v22 }
  0x40   :  { %882 = vmatprep.subr.bf16.mxu0 %v993_v11 }
  0x42   :  { %913 = vmatpush3.bf16.msra.mxu1 %v1008_v22 }
  0x43   :  { %883 = vmatpush3.bf16.msra.mxu0 %v993_v11  ;;  %914 = vmatprep.subr.bf16.mxu1 %v1009_v23 }
  0x46   :  { %885 = vmatmul.mubr.bf16.vlgmr.msra.gmra.mxu0 %v1145_v14  ;;  %915 = vmatpush3.bf16.msra.mxu1 %v1009_v23 }
  0x47   :  { %888 = vmatprep.mubr.bf16.mxu0 %v1147_v15 }
  0x4e   :  { %889 = vmatmul.mubr.bf16.gmra.mxu0 %v1151_v16 }
  0x4f   :  { %892 = vmatprep.mubr.bf16.mxu0 %v1153_v17 }
  0x56   :  { %893 = vmatmul.mubr.bf16.gmra.mxu0 %v1157_v18 }
  0x57   :  { %896 = vmatprep.mubr.bf16.mxu0 %v1159_v19 }
  0x5e   :  { %897 = vmatmul.mubr.bf16.gmra.mxu0 %v1163_v20 }
  0x5f   :  { %948 = vmatprep.mubr.bf16.mxu0 %v994_v4 }
 0x106   :  { %v886_v24 = vpop.f32.mrf.mxu0 }
 0x107   :  { %v237_v30 = vadd.f32 %v886_v24, %v715_v26 }
 0x108   :  { %v228_v25 = vpop.f32.mrf.mxu0 }
 0x109   :  { %v229_v28 = vadd.f32 %v715_v26, %v228_v25  ;;  %v293_v37 = vmax.f32 %v237_v30, 0.0 }
 0x10a   :  { %v887_v27 = vpop.f32.mrf.mxu0 }
 0x10b   :  { %v240_v29 = vadd.f32 %v887_v27, %v715_v26  ;;  %v291_v35 = vmax.f32 %v229_v28, 0.0 }
 0x10c   :  { %v231_v31 = vpop.f32.mrf.mxu0 }
 0x10d   :  { %v232_v32 = vadd.f32 %v715_v26, %v231_v31  ;;  %v294_v33 = vmax.f32 %v240_v29, 0.0 }
 0x10e   :  { %v890_v34 = vpop.f32.mrf.mxu0 }
 0x10f   :  { %v292_v36 = vmax.f32 %v232_v32, 0.0  ;;  %v308_v40 = vpack.c.bf16 %v294_v33, %v293_v37  ;;  %v253_v44 = vadd.f32 %v890_v34, %v715_v26 }
 0x110   :  { %v244_v38 = vpop.f32.mrf.mxu0 }
 0x111   :  { %v307_v39 = vpack.c.bf16 %v292_v36, %v291_v35  ;;  %v245_v42 = vadd.f32 %v715_v26, %v244_v38  ;;  %v297_v51 = vmax.f32 %v253_v44, 0.0 }
 0x112   :  { %v891_v41 = vpop.f32.mrf.mxu0 }
 0x113   :  { %v256_v43 = vadd.f32 %v891_v41, %v715_v26  ;;  %916 = vmatprep.mubr.bf16.mxu1 %v307_v39  ;;  %v295_v49 = vmax.f32 %v245_v42, 0.0 }
 0x114   :  { %v247_v45 = vpop.f32.mrf.mxu0  ;;  %917 = vmatmul.mubr.bf16.vlgmr.msra.gmra.mxu1 %v308_v40 }
 0x115   :  { %v248_v46 = vadd.f32 %v715_v26, %v247_v45  ;;  %v298_v47 = vmax.f32 %v256_v43, 0.0 }
 0x116   :  { %v894_v48 = vpop.f32.mrf.mxu0 }
 0x117   :  { %v296_v50 = vmax.f32 %v248_v46, 0.0  ;;  %v310_v54 = vpack.c.bf16 %v298_v47, %v297_v51  ;;  %v269_v58 = vadd.f32 %v894_v48, %v715_v26  ;;  %v740_v48 = vld [vmem:[%s1187_s2 + $0x1] ss:$0 sm:$0xff]  ;;  %s1101_s2 = smov [#allocation8]  }
 0x118   :  { %v260_v52 = vpop.f32.mrf.mxu0  ;;  %s702_s7 = sshll.u32 %s1101_s2, 4  ;;  %s703_s7 = int_to_ptr.vmem [resolvable:$true] %s702_s7 }
 0x119   :  { %v309_v53 = vpack.c.bf16 %v296_v50, %v295_v49  ;;  %v261_v56 = vadd.f32 %v715_v26, %v260_v52  ;;  %v301_v1 = vmax.f32 %v269_v58, 0.0  ;;  %s1070_s8 = scalar_lea.vmem %s703_s7, 1024  ;;  %p1075_p2 = scmp.lt.s32.totalorder %s703_s7, %s703_s7 }
 0x11a   :  { %v895_v55 = vpop.f32.mrf.mxu0  ;;  %p1071_p1 = scmp.ne.s32.totalorder %s703_s7, %s1070_s8  ;;  %p1076_p3 = scmp.lt.s32.totalorder %s1070_s8, %s1070_s8 }
 0x11b   :  { %v272_v57 = vadd.f32 %v895_v55, %v715_v26  ;;  %920 = vmatprep.mubr.bf16.mxu1 %v309_v53  ;;  %v299_v63 = vmax.f32 %v261_v56, 0.0 }
 0x11c   :  { %v263_v59 = vpop.f32.mrf.mxu0  ;;  %921 = vmatmul.mubr.bf16.gmra.mxu1 %v310_v54  ;;  %p1077_p4 = por %p1076_p3, %p1075_p2 }
 0x11d   :  { %v264_v60 = vadd.f32 %v715_v26, %v263_v59  ;;  %v302_v61 = vmax.f32 %v272_v57, 0.0 }
 0x11e   :  { %v898_v62 = vpop.f32.mrf.mxu0  ;;  %p1078_p5 = pnand %p1077_p4, %p1071_p1 }
 0x11f   :  { %v300_v0 = vmax.f32 %v264_v60, 0.0  ;;  %v312_v4 = vpack.c.bf16 %v302_v61, %v301_v1  ;;  %v285_v8 = vadd.f32 %v898_v62, %v715_v26 }
 0x120   :  { %v276_v2 = vpop.f32.mrf.mxu0 }
 0x121   :  { %v311_v3 = vpack.c.bf16 %v300_v0, %v299_v63  ;;  %v277_v6 = vadd.f32 %v715_v26, %v276_v2  ;;  %v305_v21 = vmax.f32 %v285_v8, 0.0 }
 0x122   :  { %v899_v5 = vpop.f32.mrf.mxu0 }
 0x123   :  { %v288_v7 = vadd.f32 %v899_v5, %v715_v26  ;;  %924 = vmatprep.mubr.bf16.mxu1 %v311_v3  ;;  %v303_v12 = vmax.f32 %v277_v6, 0.0 }
 0x124   :  { %v279_v9 = vpop.f32.mrf.mxu0  ;;  %925 = vmatmul.mubr.bf16.gmra.mxu1 %v312_v4 }
 0x125   :  { %v280_v10 = vadd.f32 %v715_v26, %v279_v9  ;;  %v306_v11 = vmax.f32 %v288_v7, 0.0 }
 0x127   :  { %v304_v13 = vmax.f32 %v280_v10, 0.0  ;;  %v314_v23 = vpack.c.bf16 %v306_v11, %v305_v21 }
 0x129   :  { %v313_v22 = vpack.c.bf16 %v304_v13, %v303_v12 }
 0x12b   :  { %928 = vmatprep.mubr.bf16.mxu1 %v313_v22 }
 0x12c   :  { %929 = vmatmul.mubr.bf16.gmra.mxu1 %v314_v23 }
 0x12d   :  { %956 = vmatprep.mubr.bf16.mxu1 %v1153_v17 }
 0x1d4   :  { %v918_v24 = vpop.f32.mrf.mxu1 }
 0x1d6   :  { %v413_v25 = vpop.f32.mrf.mxu1 }
 0x1d8   :  { %v919_v27 = vpop.f32.mrf.mxu1 }
 0x1d9   :  { %v477_v45 = vpack.c.bf16 %v919_v27, %v918_v24 }
 0x1da   :  { %v416_v28 = vpop.f32.mrf.mxu1 }
 0x1db   :  { %v476_v46 = vpack.c.bf16 %v416_v28, %v413_v25 }
 0x1dc   :  { %v922_v29 = vpop.f32.mrf.mxu1 }
 0x1de   :  { %v429_v30 = vpop.f32.mrf.mxu1 }
 0x1e0   :  { %v923_v31 = vpop.f32.mrf.mxu1 }
 0x1e1   :  { %v479_v43 = vpack.c.bf16 %v923_v31, %v922_v29 }
 0x1e2   :  { %v432_v32 = vpop.f32.mrf.mxu1 }
 0x1e3   :  { %v478_v44 = vpack.c.bf16 %v432_v32, %v429_v30 }
 0x1e4   :  { %v926_v33 = vpop.f32.mrf.mxu1 }
 0x1e6   :  { %v445_v26 = vpop.f32.mrf.mxu1 }
 0x1e8   :  { %v927_v34 = vpop.f32.mrf.mxu1 }
 0x1e9   :  { %v481_v17 = vpack.c.bf16 %v927_v34, %v926_v33 }
 0x1ea   :  { %v448_v35 = vpop.f32.mrf.mxu1 }
 0x1eb   :  { %v480_v42 = vpack.c.bf16 %v448_v35, %v445_v26 }
 0x1ec   :  { %v930_v36 = vpop.f32.mrf.mxu1 }
 0x1ee   :  { %v461_v37 = vpop.f32.mrf.mxu1 }
 0x1f0   :  { %v931_v38 = vpop.f32.mrf.mxu1 }
 0x1f1   :  { %v483_v39 = vpack.c.bf16 %v931_v38, %v930_v36 }
 0x1f2   :  { %v464_v40 = vpop.f32.mrf.mxu1 }
 0x1f3   :  { %v482_v41 = vpack.c.bf16 %v464_v40, %v461_v37  ;;  %932 = vmatprep.subr.bf16.mxu0 %v483_v39  ;;  %964 = vmatprep.subr.bf16.mxu1 %v483_v39 }
 0x1f4   :  { %933 = vmatpush3.bf16.msra.mxu0 %v483_v39  ;;  %972 = vmatpush3.bf16.msra.mxu1 %v483_v39 }
 0x1f5   :  { %934 = vmatprep.subr.bf16.mxu0 %v482_v41  ;;  %965 = vmatprep.subr.bf16.mxu1 %v482_v41 }
 0x1f8   :  { %935 = vmatpush3.bf16.msra.mxu0 %v482_v41  ;;  %973 = vmatpush3.bf16.msra.mxu1 %v482_v41 }
 0x1f9   :  { %936 = vmatprep.subr.bf16.mxu0 %v481_v17  ;;  %966 = vmatprep.subr.bf16.mxu1 %v481_v17 }
 0x1fc   :  { %937 = vmatpush3.bf16.msra.mxu0 %v481_v17  ;;  %974 = vmatpush3.bf16.msra.mxu1 %v481_v17 }
 0x1fd   :  { %938 = vmatprep.subr.bf16.mxu0 %v480_v42  ;;  %967 = vmatprep.subr.bf16.mxu1 %v480_v42 }
 0x200   :  { %939 = vmatpush3.bf16.msra.mxu0 %v480_v42  ;;  %975 = vmatpush3.bf16.msra.mxu1 %v480_v42 }
 0x201   :  { %940 = vmatprep.subr.bf16.mxu0 %v479_v43  ;;  %968 = vmatprep.subr.bf16.mxu1 %v479_v43 }
 0x204   :  { %941 = vmatpush3.bf16.msra.mxu0 %v479_v43  ;;  %976 = vmatpush3.bf16.msra.mxu1 %v479_v43 }
 0x205   :  { %942 = vmatprep.subr.bf16.mxu0 %v478_v44  ;;  %969 = vmatprep.subr.bf16.mxu1 %v478_v44 }
 0x208   :  { %943 = vmatpush3.bf16.msra.mxu0 %v478_v44  ;;  %977 = vmatpush3.bf16.msra.mxu1 %v478_v44 }
 0x209   :  { %944 = vmatprep.subr.bf16.mxu0 %v477_v45  ;;  %970 = vmatprep.subr.bf16.mxu1 %v477_v45 }
 0x20c   :  { %945 = vmatpush3.bf16.msra.mxu0 %v477_v45  ;;  %978 = vmatpush3.bf16.msra.mxu1 %v477_v45 }
 0x20d   :  { %946 = vmatprep.subr.bf16.mxu0 %v476_v46  ;;  %971 = vmatprep.subr.bf16.mxu1 %v476_v46 }
 0x210   :  { %947 = vmatpush3.bf16.msra.mxu0 %v476_v46  ;;  %979 = vmatpush3.bf16.msra.mxu1 %v476_v46 }
 0x213   :  { %949 = vmatmul.mubr.bf16.vlgmr.msra.gmra.mxu0 %v1145_v14  ;;  %957 = vmatmul.mubr.bf16.vlgmr.msra.gmra.mxu1 %v1157_v18 }
 0x214   :  { %952 = vmatprep.mubr.bf16.mxu0 %v1147_v15  ;;  %960 = vmatprep.mubr.bf16.mxu1 %v1159_v19 }
 0x21b   :  { %953 = vmatmul.mubr.bf16.gmra.mxu0 %v1151_v16  ;;  %961 = vmatmul.mubr.bf16.gmra.mxu1 %v1163_v20 }
 0x2d3   :  { %v950_v47 = vpop.f32.mrf.mxu0  ;;  %v958_v56 = vpop.f32.mrf.mxu1 }
 0x2d4   :  { %v531_v15 = vadd.f32 %v950_v47, %v740_v48  ;;  %v563_v1 = vadd.f32 %v958_v56, %v740_v48 }
 0x2d5   :  { %v522_v49 = vpop.f32.mrf.mxu0  ;;  %v554_v58 = vpop.f32.mrf.mxu1 }
 0x2d6   :  { %v523_v50 = vadd.f32 %v740_v48, %v522_v49  ;;  %v555_v61 = vadd.f32 %v740_v48, %v554_v58 }
 0x2d7   :  { %v951_v51 = vpop.f32.mrf.mxu0  ;;  %v959_v60 = vpop.f32.mrf.mxu1 }
 0x2d8   :  { %585 = vxpose.xlu0.b32.start [1/16] %v523_v50, 128  ;;  %v534_v19 = vadd.f32 %v951_v51, %v740_v48  ;;  %v566_v3 = vadd.f32 %v959_v60, %v740_v48 }
 0x2d9   :  { %v525_v14 = vpop.f32.mrf.mxu0  ;;  %v557_v62 = vpop.f32.mrf.mxu1 }
 0x2da   :  { %v526_v52 = vadd.f32 %v740_v48, %v525_v14  ;;  %v558_v63 = vadd.f32 %v740_v48, %v557_v62 }
 0x2db   :  { %v954_v18 = vpop.f32.mrf.mxu0  ;;  %v962_v0 = vpop.f32.mrf.mxu1 }
 0x2dc   :  { %586 = vxpose.xlu0.b32.cont [2/16] %v526_v52, 128  ;;  %v547_v57 = vadd.f32 %v954_v18, %v740_v48  ;;  %v579_v8 = vadd.f32 %v962_v0, %v740_v48 }
 0x2dd   :  { %v538_v53 = vpop.f32.mrf.mxu0  ;;  %v570_v2 = vpop.f32.mrf.mxu1 }
 0x2de   :  { %v539_v20 = vadd.f32 %v740_v48, %v538_v53  ;;  %v571_v5 = vadd.f32 %v740_v48, %v570_v2 }
 0x2df   :  { %v955_v16 = vpop.f32.mrf.mxu0  ;;  %v963_v4 = vpop.f32.mrf.mxu1 }
 0x2e0   :  { %587 = vxpose.xlu0.b32.cont [3/16] %v531_v15, 128  ;;  %v550_v59 = vadd.f32 %v955_v16, %v740_v48  ;;  %v582_v9 = vadd.f32 %v963_v4, %v740_v48 }
 0x2e1   :  { %v541_v54 = vpop.f32.mrf.mxu0  ;;  %v573_v6 = vpop.f32.mrf.mxu1 }
 0x2e2   :  { %v542_v55 = vadd.f32 %v740_v48, %v541_v54  ;;  %v574_v7 = vadd.f32 %v740_v48, %v573_v6 }
 0x2e4   :  { %588 = vxpose.xlu0.b32.cont [4/16] %v534_v19, 128 }
 0x2e8   :  { %589 = vxpose.xlu0.b32.cont [5/16] %v539_v20, 128 }
 0x2ec   :  { %590 = vxpose.xlu0.b32.cont [6/16] %v542_v55, 128 }
 0x2f0   :  { %591 = vxpose.xlu0.b32.cont [7/16] %v547_v57, 128 }
 0x2f4   :  { %592 = vxpose.xlu0.b32.cont [8/16] %v550_v59, 128 }
 0x2f8   :  { %593 = vxpose.xlu0.b32.cont [9/16] %v555_v61, 128 }
 0x2fc   :  { %594 = vxpose.xlu0.b32.cont [10/16] %v558_v63, 128 }
 0x300   :  { %595 = vxpose.xlu0.b32.cont [11/16] %v563_v1, 128 }
 0x304   :  { %596 = vxpose.xlu0.b32.cont [12/16] %v566_v3, 128 }
 0x308   :  { %597 = vxpose.xlu0.b32.cont [13/16] %v571_v5, 128 }
 0x30c   :  { %598 = vxpose.xlu0.b32.cont [14/16] %v574_v7, 128 }
 0x310   :  { %599 = vxpose.xlu0.b32.cont [15/16] %v579_v8, 128 }
 0x314   :  { %600 = vxpose.xlu0.b32.end [16/16] %v582_v9, 128 }
 0x354   :  { %v601_v10 = vpop.trf.xlu0 }
 0x358   :  { %v602_v11 = vpop.trf.xlu0 }
 0x359   :  { %v776_v12 = vpack.c.bf16 %v602_v11, %v601_v10 }
 0x35b   :  { %777 = vst [vmem:[#allocation8] sm:$0xff] %v776_v12  }
 0x35c   :  { %v603_v13 = vpop.trf.xlu0 }
 0x360   :  { %v604_v21 = vpop.trf.xlu0 }
 0x361   :  { %v781_v22 = vpack.c.bf16 %v604_v21, %v603_v13 }
 0x363   :  { %813 = vst [vmem:[#allocation8 + $0x8] sm:$0xff] %v781_v22  }
 0x364   :  { %v605_v23 = vpop.trf.xlu0 }
 0x368   :  { %v606_v24 = vpop.trf.xlu0 }
 0x369   :  { %v786_v25 = vpack.c.bf16 %v606_v24, %v605_v23 }
 0x36b   :  { %814 = vst [vmem:[#allocation8 + $0x10] sm:$0xff] %v786_v25  }
 0x36c   :  { %v607_v27 = vpop.trf.xlu0 }
 0x370   :  { %v608_v28 = vpop.trf.xlu0 }
 0x371   :  { %v791_v29 = vpack.c.bf16 %v608_v28, %v607_v27 }
 0x373   :  { %815 = vst [vmem:[#allocation8 + $0x18] sm:$0xff] %v791_v29  }
 0x374   :  { %v609_v30 = vpop.trf.xlu0 }
 0x378   :  { %v610_v31 = vpop.trf.xlu0 }
 0x379   :  { %v796_v32 = vpack.c.bf16 %v610_v31, %v609_v30 }
 0x37b   :  { %816 = vst [vmem:[#allocation8 + $0x20] sm:$0xff] %v796_v32  }
 0x37c   :  { %v611_v33 = vpop.trf.xlu0 }
 0x380   :  { %v612_v26 = vpop.trf.xlu0 }
 0x381   :  { %v801_v34 = vpack.c.bf16 %v612_v26, %v611_v33 }
 0x383   :  { %817 = vst [vmem:[#allocation8 + $0x28] sm:$0xff] %v801_v34  }
 0x384   :  { %v613_v35 = vpop.trf.xlu0 }
 0x388   :  { %v614_v36 = vpop.trf.xlu0 }
 0x389   :  { %v806_v37 = vpack.c.bf16 %v614_v36, %v613_v35 }
 0x38b   :  { %818 = vst [vmem:[#allocation8 + $0x30] sm:$0xff] %v806_v37  }
 0x38c   :  { %v615_v38 = vpop.trf.xlu0 }
 0x390   :  { %v616_v39 = vpop.trf.xlu0 }
 0x391   :  { %v811_v40 = vpack.c.bf16 %v616_v39, %v615_v38 }
 0x393   :  { %819 = vst [vmem:[#allocation8 + $0x38] sm:$0xff] %v811_v40  }
 0x394   :  { %1081 = shalt.err (!%p1078_p5)
}
 0x395   :  { %708 = dma.vmem_to_hbm [thread:$0]  %s703_s7, 1024, %s1189_s4, [#allocation4], %s1098_s20, %s1098_s20, %s1099_s21  }
 0x396   :  { %1094 = dma.done.wait [#allocation4], 1024  }
 0x397   :  { %1095 = vsyncadd [#allocation4], 4294966272 }
 0x398   :  { %712 = vsyncpa [#allocation3], 1 }
 0x399   :  { %713 = vsyncpa [#allocation6], 1 }
 0x39a   :  { %714 = vsyncpa [#allocation4], 1 }

</bundles_post_ra>
